<compile_context>
chip_gen: v5e
topology: v5e:2x2
jax: 0.10.0
libtpu: 0.0.40
codegen_flags: <defaults>
</compile_context>

<pallas_src>
import jax
import jax.numpy as jnp
from jax.experimental import pallas as pl
from jax.experimental.pallas import tpu as pltpu


def _round_up(x, m):
    return ((x + m - 1) // m) * m


def _nll_loss_kernel(logp_ref, label_ref, out_ref, acc_ref):
    # logp_ref : [TILE_N, C]   log-probabilities, native dtype
    # label_ref: [TILE_N, 1]   int32 class ids (sentinel == C for padded rows)
    # out_ref  : [1, 8, 128]   f32 per-core partial sum (written once, last step)
    # acc_ref  : [TILE_N, 1]   f32 VMEM scratch, carried across the inner axis
    j = pl.program_id(1)

    @pl.when(j == 0)
    def _init():
        acc_ref[...] = jnp.zeros_like(acc_ref)

    logp = logp_ref[...]                     # [TILE_N, C]
    lab = label_ref[...]                     # [TILE_N, 1]
    tn, c = logp.shape

    # One-hot select of the labelled log-prob (pure VPU). Padded rows carry a
    # sentinel label >= C, so they select nothing (no per-element row mask).
    col = jax.lax.broadcasted_iota(jnp.int32, (tn, c), 1)
    picked = jnp.where(col == lab, logp, jnp.zeros_like(logp))

    # Lane-axis reduce per tile. Exact in any dtype (<= 1 non-zero per row),
    # so only the [TILE_N, 1] row-sum is upcast before f32 accumulation.
    acc_ref[...] += jnp.sum(picked, axis=1, keepdims=True).astype(jnp.float32)

    @pl.when(j == pl.num_programs(1) - 1)
    def _finalize():
        total = jnp.sum(acc_ref[...])        # single cross-sublane reduce per core
        # Lane-dense full-block store of the per-core partial.
        out_ref[...] = jnp.zeros(out_ref.shape, out_ref.dtype) + total


def nll_loss_pallas(classification_output, label, *, tile_n=None):
    """Mean-reduced NLL loss. classification_output: [N, C] log-probs; label: [N]."""
    n, c = classification_output.shape
    logp = classification_output                       # keep native dtype (no wrapper cast)
    itemsize = jnp.dtype(logp.dtype).itemsize

    # Per-row byte costs.
    row_stream = c * itemsize                          # HBM bytes per row (log-probs)
    # VMEM per row: 2x double-buffered logp + 2x lane-padded (x128) int32 label
    # column + f32 accumulator column.
    row_vmem = 2 * row_stream + 2 * 512 + 512
    pack = max(1, 4 // itemsize) * 8                   # sublane packing: f32->8, bf16->16

    if tile_n is None:
        tile_bytes_target = 6 * 1024 * 1024            # log-prob bytes streamed per step
        vmem_budget = 20 * 1024 * 1024                 # tiles + labels + acc must fit here
        tile_n = min(tile_bytes_target // row_stream, vmem_budget // row_vmem)
    tile_n = max(pack, (int(tile_n) // pack) * pack)
    tile_n = min(tile_n, _round_up(n, pack))

    num_tiles = pl.cdiv(n, tile_n)
    tiles_per_core = pl.cdiv(num_tiles, 2)             # outer axis of 2 -> megacore on v7x
    n_pad = 2 * tiles_per_core * tile_n

    # Sentinel-pad labels (== C never matches any class) so ragged / clamped
    # tiles contribute exactly zero to the numerator.
    labels = jnp.pad(label.astype(jnp.int32).reshape(n, 1),
                     ((0, n_pad - n), (0, 0)), constant_values=c)

    def logp_index(p, j):
        # Clamp: when num_tiles is odd, the second core's last step re-reads the
        # final valid block; its sentinel labels make the contribution zero.
        return (jnp.minimum(p * tiles_per_core + j, num_tiles - 1), 0)

    def label_index(p, j):
        return (p * tiles_per_core + j, 0)             # labels are padded -> always in range

    # Scoped-VMEM request derived from the actual tile footprint (+ headroom);
    # never ask for the full 64 MiB physical VMEM of a v7x core.
    vmem_needed = tile_n * row_vmem + 2 * 8 * 128 * 4
    vmem_limit = max(16 * 1024 * 1024, int(vmem_needed) + 4 * 1024 * 1024)

    partials = pl.pallas_call(
        _nll_loss_kernel,
        out_shape=jax.ShapeDtypeStruct((2, 8, 128), jnp.float32),
        grid_spec=pltpu.PrefetchScalarGridSpec(
            num_scalar_prefetch=0,
            grid=(2, tiles_per_core),
            in_specs=[
                pl.BlockSpec((tile_n, c), logp_index),
                pl.BlockSpec((tile_n, 1), label_index),
            ],
            out_specs=pl.BlockSpec((1, 8, 128), lambda p, j: (p, 0, 0)),
            scratch_shapes=[pltpu.VMEM((tile_n, 1), jnp.float32)],
        ),
        compiler_params=pltpu.CompilerParams(
            dimension_semantics=("parallel", "arbitrary"),
            vmem_limit_bytes=vmem_limit,
        ),
        cost_estimate=pl.CostEstimate(
            flops=3 * n * c,                            # iota-compare + select + add
            transcendentals=0,
            bytes_accessed=n * c * itemsize + 4 * n_pad + 2 * 8 * 128 * 4,
        ),
    )(logp, labels)

    # Tiny epilogue on a (2,) vector: combine per-core partials, negate, 1/N.
    return -(jnp.sum(partials[:, 0, 0]) / n)


if __name__ == "__main__":
    key = jax.random.PRNGKey(0)
    k_logits, k_label = jax.random.split(key)

    # Small, module-consistent shapes: batch=60 (ragged last tile), classes=128
    # (lane-dense). NLLLoss expects log-probabilities as its input.
    N, C = 60, 128
    logits = jax.random.normal(k_logits, (N, C), dtype=jnp.float32)
    log_probs = jax.nn.log_softmax(logits, axis=-1)
    label = jax.random.randint(k_label, (N,), 0, C, dtype=jnp.int32)

    ref = -jnp.mean(log_probs[jnp.arange(N), label])   # mirrors torch.nn.NLLLoss()

    # 1) Small explicit tile -> (2, 2) grid: exercises multi-step accumulation,
    #    the ragged last tile, and both per-core partial outputs.
    loss_small = jax.block_until_ready(nll_loss_pallas(log_probs, label, tile_n=16))
    assert jnp.allclose(loss_small, ref, rtol=1e-5, atol=1e-5), (loss_small, ref)

    # 2) Auto (byte-based) tile sizing -> single block; the second core's step
    #    is clamped + sentinel-masked and contributes exactly zero.
    loss_auto = jax.block_until_ready(nll_loss_pallas(log_probs, label))
    assert jnp.allclose(loss_auto, ref, rtol=1e-5, atol=1e-5), (loss_auto, ref)

    # 3) bf16 log-probs streamed in native dtype (no wrapper upcast).
    lp_bf16 = log_probs.astype(jnp.bfloat16)
    ref_bf16 = -jnp.mean(lp_bf16.astype(jnp.float32)[jnp.arange(N), label])
    loss_bf16 = jax.block_until_ready(nll_loss_pallas(lp_bf16, label, tile_n=32))
    assert jnp.allclose(loss_bf16, ref_bf16, rtol=1e-3, atol=1e-3), (loss_bf16, ref_bf16)

    print("KERNEL_OK")
</pallas_src>

<mosaic_0001>
module attributes {stable_mosaic.version = 11 : i64} {
  func.func @_nll_loss_kernel(%arg0: i32, %arg1: i32, %arg2: memref<16x128xf32, #tpu.memory_space<vmem>>, %arg3: memref<16x1xi32, #tpu.memory_space<vmem>>, %arg4: memref<1x8x128xf32, #tpu.memory_space<vmem>>, %arg5: memref<16x1xf32, #tpu.memory_space<vmem>>) attributes {dimension_semantics = [#tpu.dimension_semantics<parallel>, #tpu.dimension_semantics<arbitrary>], iteration_bounds = array<i64: 2, 2>, scalar_prefetch = 0 : i64, scratch_operands = 1 : i64, tpu.core_type = #tpu.core_type<tc>, window_params = [{transform_indices = @transform_0, window_bounds = array<i64: 16, 128>}, {transform_indices = @transform_1, window_bounds = array<i64: 16, 1>}, {transform_indices = @transform_2, window_bounds = array<i64: 1, 8, 128>}]} {
    %c0_i32 = arith.constant 0 : i32
    %0 = arith.cmpi eq, %arg1, %c0_i32 : i32
    %1 = arith.extui %0 : i1 to i32
    %c0_i32_0 = arith.constant 0 : i32
    %2 = arith.cmpi ne, %1, %c0_i32_0 : i32
    scf.if %2 {
      %cst_10 = arith.constant 0.000000e+00 : f32
      %18 = vector.broadcast %cst_10 : f32 to vector<16x1xf32>
      %c0_11 = arith.constant 0 : index
      %c0_12 = arith.constant 0 : index
      %19 = vector.load %arg5[%c0_11, %c0_12] : memref<16x1xf32, #tpu.memory_space<vmem>>, vector<16x1xf32>
      tpu.vector_store %arg5[%c0_11, %c0_12], %18 {strides = array<i32>} : memref<16x1xf32, #tpu.memory_space<vmem>>, vector<16x1xf32>,
    } else {
    }
    %c0 = arith.constant 0 : index
    %c0_1 = arith.constant 0 : index
    %3 = vector.load %arg2[%c0, %c0_1] : memref<16x128xf32, #tpu.memory_space<vmem>>, vector<16x128xf32>
    %c0_2 = arith.constant 0 : index
    %c0_3 = arith.constant 0 : index
    %4 = vector.load %arg3[%c0_2, %c0_3] : memref<16x1xi32, #tpu.memory_space<vmem>>, vector<16x1xi32>
    %5 = tpu.iota {dimensions = array<i32: 1>} : vector<16x128xi32>
    %6 = vector.broadcast %4 : vector<16x1xi32> to vector<16x128xi32>
    %7 = arith.cmpi eq, %5, %6 : vector<16x128xi32>
    %cst = arith.constant 0.000000e+00 : f32
    %8 = vector.broadcast %cst : f32 to vector<16x128xf32>
    %9 = arith.select %7, %3, %8 : vector<16x128xi1>, vector<16x128xf32>
    %c0_4 = arith.constant 0 : index
    %c0_5 = arith.constant 0 : index
    %10 = vector.load %arg5[%c0_4, %c0_5] : memref<16x1xf32, #tpu.memory_space<vmem>>, vector<16x1xf32>
    %cst_6 = arith.constant dense<0.000000e+00> : vector<16xf32>
    %11 = vector.multi_reduction <add>, %9, %cst_6 [1] : vector<16x128xf32> to vector<16xf32>
    %12 = vector.shape_cast %11 : vector<16xf32> to vector<16x1xf32>
    %13 = arith.addf %10, %12 : vector<16x1xf32>
    %c0_7 = arith.constant 0 : index
    %c0_8 = arith.constant 0 : index
    %14 = vector.load %arg5[%c0_7, %c0_8] : memref<16x1xf32, #tpu.memory_space<vmem>>, vector<16x1xf32>
    tpu.vector_store %arg5[%c0_7, %c0_8], %13 {strides = array<i32>} : memref<16x1xf32, #tpu.memory_space<vmem>>, vector<16x1xf32>,
    %c1_i32 = arith.constant 1 : i32
    %15 = arith.cmpi eq, %arg1, %c1_i32 : i32
    %16 = arith.extui %15 : i1 to i32
    %c0_i32_9 = arith.constant 0 : i32
    %17 = arith.cmpi ne, %16, %c0_i32_9 : i32
    scf.if %17 {
      %c0_10 = arith.constant 0 : index
      %c0_11 = arith.constant 0 : index
      %18 = vector.load %arg5[%c0_10, %c0_11] : memref<16x1xf32, #tpu.memory_space<vmem>>, vector<16x1xf32>
      %19 = vector.shape_cast %18 : vector<16x1xf32> to vector<1x16x1xf32>
      %cst_12 = arith.constant dense<0.000000e+00> : vector<1xf32>
      %20 = vector.multi_reduction <add>, %19, %cst_12 [1, 2] : vector<1x16x1xf32> to vector<1xf32>
      %21 = vector.shape_cast %20 : vector<1xf32> to vector<1x1x1xf32>
      %22 = vector.extract %21[0, 0, 0] : f32 from vector<1x1x1xf32>
      %cst_13 = arith.constant 0.000000e+00 : f32
      %23 = vector.broadcast %cst_13 : f32 to vector<1x8x128xf32>
      %24 = vector.broadcast %22 : f32 to vector<1x8x128xf32>
      %25 = arith.addf %23, %24 : vector<1x8x128xf32>
      %c0_14 = arith.constant 0 : index
      %c0_15 = arith.constant 0 : index
      %c0_16 = arith.constant 0 : index
      %26 = vector.load %arg4[%c0_14, %c0_15, %c0_16] : memref<1x8x128xf32, #tpu.memory_space<vmem>>, vector<1x8x128xf32>
      tpu.vector_store %arg4[%c0_14, %c0_15, %c0_16], %25 {strides = array<i32>} : memref<1x8x128xf32, #tpu.memory_space<vmem>>, vector<1x8x128xf32>,
    } else {
    }
    return
  }
  func.func @transform_0(%arg0: i32, %arg1: i32) -> (i32, i32) {
    %c2_i32 = arith.constant 2 : i32
    %0 = arith.muli %arg0, %c2_i32 : i32
    %1 = arith.addi %0, %arg1 : i32
    %c3_i32 = arith.constant 3 : i32
    %2 = arith.minsi %1, %c3_i32 : i32
    %c0_i32 = arith.constant 0 : i32
    %c0_i32_0 = arith.constant 0 : i32
    return %2, %c0_i32 : i32, i32
  }
  func.func @transform_1(%arg0: i32, %arg1: i32) -> (i32, i32) {
    %c2_i32 = arith.constant 2 : i32
    %0 = arith.muli %arg0, %c2_i32 : i32
    %1 = arith.addi %0, %arg1 : i32
    %c0_i32 = arith.constant 0 : i32
    %c0_i32_0 = arith.constant 0 : i32
    return %1, %c0_i32 : i32, i32
  }
  func.func @transform_2(%arg0: i32, %arg1: i32) -> (i32, i32, i32) {
    %c0_i32 = arith.constant 0 : i32
    %c0_i32_0 = arith.constant 0 : i32
    %c0_i32_1 = arith.constant 0 : i32
    return %arg0, %c0_i32, %c0_i32_0 : i32, i32, i32
  }
}

</mosaic_0001>

<bundles_post_ra>
// kernel: tpu_custom_call.1
= control target key start
LH: loop header
LB: loop body
LE: loop exit
PB: predicated region body
PF: predicated region fallthrough
CT: control target
= control target key end

     0   :  { %7 = vsyncpa [#allocation4], 0  ;;  %s717_s0 = inlined_call_operand.vmem [shape: f32[60,128], index: 0, kind: input, shape index: {}]   ;;  %s718_s1 = inlined_call_operand.vmem [shape: s32[64,1], index: 1, kind: input, shape index: {}]   ;;  %s719_s2 = inlined_call_operand.hbm [shape: f32[2,8,128], index: 2, kind: output, shape index: {}]  }
   0x1   :  { %9 = vsyncpa [#allocation4 + $0x1], 0  ;;  %s584_s9 = smov 0   ;;  %s586_s10 = smov 0  }
   0x2   :  { %s588_s11 = smov 0   ;;  %s590_s12 = smov 0  }
   0x3   :  { %s592_s13 = smov 0   ;;  %s594_s14 = smov 0  }
   0x4   :  { %s596_s15 = smov 0   ;;  %s598_s16 = smov 0  }
   0x5 LB: > { %s373_s17 = sadd.s32 4294967295, %s565_s16   ;;  %s374_s18 = sadd.s32 4294967294, %s565_s16   ;;  %s565_s16 = sphi %s598_s16, %s15_s16   ;;  %s561_s15 = sphi %s596_s15, %s728_s15   ;;  %s557_s14 = sphi %s594_s14, %s727_s14   ;;  %s553_s13 = sphi %s592_s13, %s726_s13   ;;  %s549_s12 = sphi %s590_s12, %s725_s12   ;;  %s545_s11 = sphi %s588_s11, %s724_s11   ;;  %s541_s10 = sphi %s586_s10, %s723_s10   ;;  %s537_s9 = sphi %s584_s9, %s722_s9  }
   0x6   : > { %s24_s19 = sadd.s32 1, %s557_s14  ;;  %s27_s20 = sadd.s32 1, %s561_s15 }
   0x7   : > { %p25_p0 = scmp.ge.s32.totalorder %s24_s19, 2  ;;  %p108_p1 = scmp.ne.s32.totalorder %s545_s11, %s541_s10 }
   0x8   : > { %p109_p2 = scmp.eq.s32.totalorder %s373_s17, 3  ;;  %p114_p4 = scmp.ne.s32.totalorder %s541_s10, %s537_s9 }
   0x9   : > { %s730_s19 = smov (%p25_p0, %s24_s19), 0  ;;  %s732_s20 = smov (!%p25_p0, %s27_s20), %s561_s15 }
   0xa   : > { %p633_p3 = por %p109_p2, %p108_p1  ;;  %p29_p5 = scmp.ge.s32.totalorder %s732_s20, 2 }
   0xb   : > { %p115_p6 = scmp.eq.s32.totalorder %s374_s18, 3  ;;  %p381_p7 = scmp.ge.s32.totalorder %s565_s16, 1 }
   0xc   : > { %p163_p8 = scmp.lt.s32.totalorder %s565_s16, 5  ;;  %s734_s20 = smov (%p29_p5, %s732_s20), 0 }
   0xd   : > { %p643_p9 = por %p115_p6, %p114_p4  ;;  %s95_s23 = ssub.s32 %s561_s15, %s734_s20 }
   0xe   : > { %p164_p10 = pnand %p381_p7, %p163_p8  ;;  %s98_s24 = sadd.s32 1, %s545_s11 }
   0xf   : > { %p96_p11 = scmp.eq.s32.totalorder %s95_s23, 0  ;;  %s193_s26 = sand.u32 (!%p164_p10), 1, %s541_s10  }
  0x10   : > { %167 = sbr.rel (%p164_p10) target bundleno = 483 (0x1e3), region = 28  ;;  %s383_s27 = sshll.u32 (!%p164_p10), %s553_s13, 1 }
  0x11   : > { %s651_s25 = scalar_select %p96_p11, %s545_s11, %s98_s24  }
  0x12   : > { %s657_s28 = sshll.u32 (!%p164_p10), %s193_s26, 3  ;;  %s197_s29 = sadd.s32 (!%p164_p10), %s549_s12, %s383_s27 }
  0x13   : > { %p198_p12 = scmp.lt.s32.totalorder (!%p164_p10), %s197_s29, 3  ;;  %s387_s30 = sshll.u32 (!%p164_p10), %s197_s29, 1 }
  0x14   : > { %p213_p13 = scmp.lt.s32.totalorder (!%p164_p10), %s387_s30, 7  ;;  %s195_s24 = scalar_lea.vmem (!%p164_p10), [#allocation3], %s657_s28 }
  0x15   : > { %s736_s29 = smov (!%p198_p12, %s197_s29), 3  ;;  %p389_p1 = scmp.ne.s32.totalorder %s549_s12, 0 }
  0x16   : > { %s384_s3 = sshll.u32 %s736_s29, 1  ;;  %s738_s30 = smov (!%p213_p13, %s387_s30), 7 }
  0x17   : > { %p201_p0 = scmp.lt.s32.totalorder %s384_s3, 7  ;;  %s388_s4 = sshll.u32 %s738_s30, 3 }
  0x18   : > { %s216_s8 = scalar_lea.vmem %s718_s1, %s388_s4  ;;  %223 = sbr.rel (%p389_p1) target bundleno = 32 (0x20), region = 32 }
  0x19   : > { %s740_s3 = smov (!%p201_p0, %s384_s3), 7 }
  0x1a   : > { %s385_s5 = sshll.u32 %s740_s3, 3 }
  0x1b   : > { %s204_s23 = scalar_lea.vmem %s717_s0, %s385_s5 }
  0x1d   : > { %vm224_vm0 = vcmask 7168   ;;  %v567_v0 = vmov 0.0  }
  0x1e   : > { %225 = vst.msk [vmem:[#allocation2] sm:$0xff] %vm224_vm0, %v567_v0 }
  0x1f   : > { %226 = vst.msk [vmem:[#allocation2 + $0x8] sm:$0xff] %vm224_vm0, %v567_v0 }
  0x20 PF: > { %v229_v1 = vld [vmem:[%s216_s8] sm:$0xff]  ;;  %v568_v2 = vmov 0   ;;  %v230_v3 = vld [vmem:[%s216_s8 + $0x8] sm:$0xff]  ;;  %v231_v4 = vlaneseq  ;;  %vm251_vm3 = vcmask 7168   ;;  %p390_p2 = scmp.ne.s32.totalorder %s549_s12, 1 }
  0x21   : > { %470 = vset.pattern.permute.xlu0 %v568_v2  ;;  %v227_v6 = vld [vmem:[%s204_s23] sm:$0xff]  ;;  %v228_v9 = vld [vmem:[%s204_s23 + $0x8] sm:$0xff] }
  0x22   : > { %234 = vperm.xlu0 %470, %v229_v1   ;;  %v232_v5 = vand.u32 127, %v231_v4 }
  0x25   : > { %v243_v12 = vld [vmem:[#allocation2] sm:$0xff] }
  0x26   : > { %v244_v15 = vld [vmem:[#allocation2 + $0x8] sm:$0xff] }
  0x2a   : > { %237 = vperm.xlu0 %470, %v230_v3  }
  0x94   : > { %v235_v7 = vpop.permute.xlu0 %234 }
  0x95   : > { %vm239_vm1 = vcmp.eq.s32.totalorder %v232_v5, %v235_v7 }
  0x96   : > { %v241_v8 = vsel %vm239_vm1, %v227_v6, 0.0 }
  0x97   : > { %245 = vadd.xlane.f32.xlu1 %v241_v8 }
  0x9c   : > { %v238_v10 = vpop.permute.xlu0 %237 }
  0x9d   : > { %vm240_vm2 = vcmp.eq.s32.totalorder %v232_v5, %v238_v10 }
  0x9e   : > { %v242_v11 = vsel %vm240_vm2, %v228_v9, 0.0 }
  0x9f   : > { %247 = vadd.xlane.f32.xlu1 %v242_v11 }
 0x10a   : > { %v246_v13 = vpop.xlane.xlu1 %245 }
 0x10b   : > { %v249_v14 = vadd.f32 %v246_v13, %v243_v12 }
 0x10d   : > { %252 = vst.msk [vmem:[#allocation2] sm:$0xff] %vm251_vm3, %v249_v14 }
 0x111   : > { %257 = sbr.rel (%p390_p2) target bundleno = 468 (0x1d4), region = 36 }
 0x112   : > { %v248_v16 = vpop.xlane.xlu1 %247 }
 0x113   : > { %v250_v17 = vadd.f32 %v248_v16, %v244_v15 }
 0x115   : > { %253 = vst.msk [vmem:[#allocation2 + $0x8] sm:$0xff] %vm251_vm3, %v250_v17 }
 0x116   : > { %v258_v18 = vld [vmem:[#allocation2] sm:$0xff] }
 0x117   : > { %v260_v20 = vsel %vm251_vm3, %v258_v18, 0.0 }
 0x11c   : > { %v259_v19 = vld [vmem:[#allocation2 + $0x8] sm:$0xff] }
 0x11d   : > { %v261_v21 = vsel %vm251_vm3, %v259_v19, 0.0 }
 0x11e   : > { %v262_v22 = vadd.f32 %v261_v21, %v260_v20 }
 0x120   : > { %263 = vadd.xlane.f32.xlu0 %v262_v22 }
 0x193   : > { %v264_v23 = vpop.xlane.xlu0 %263 }
 0x194   : > { %v265_v24 = vrot.slane %v264_v23, 4 }
 0x196   : > { %v266_v25 = vadd.f32 %v265_v24, %v264_v23 }
 0x198   : > { %v267_v26 = vrot.slane %v266_v25, 2 }
 0x19a   : > { %v268_v27 = vadd.f32 %v267_v26, %v266_v25 }
 0x19c   : > { %v269_v28 = vrot.slane %v268_v27, 1 }
 0x19e   : > { %v270_v29 = vadd.f32 %v269_v28, %v268_v27 }
 0x1a0   : > { %395 = vpush %v270_v29 }
 0x1d1   : > { %s396_s27 = spop %395 }
 0x1d2   : > { %v272_v30 = vstv %s396_s27 }
 0x1d3   : > { %274 = vst [vmem:[%s195_s24] sm:$0xff] %v272_v30 }
 0x1d4 PF: > { %s392_s12 = sshll.u32 %s553_s13, 3  ;;  %s288_s4 = sshll.u32 %s195_s24, 4  ;;  %s289_s4 = int_to_ptr.vmem [resolvable:$true] %s288_s4 }
 0x1d5   : > { %s286_s3 = scalar_lea.hbm %s719_s2, %s392_s12  ;;  %s276_s6 = scalar_lea.sflag [#allocation4], %s193_s26 }
 0x1d6   : > { %s290_s5 = sshll.u32 %s286_s3, 4  ;;  %s491_s18 = scalar_lea.hbm %s719_s2, 16  ;;  %s291_s5 = int_to_ptr.hbm [resolvable:$true] %s290_s5 }
 0x1d7   : > { %s485_s7 = sshra.s32 %s291_s5, 4  ;;  %s486_s7 = int_to_ptr.hbm [resolvable:$true] %s485_s7 }
 0x1d8   : > { %s487_s8 = scalar_lea.hbm %s486_s7, 8  ;;  %p492_p7 = scmp.lt.s32.totalorder %s486_s7, %s719_s2 }
 0x1d9   : > { %p488_p4 = scmp.ne.s32.totalorder %s486_s7, %s487_s8  ;;  %p493_p8 = scmp.lt.s32.totalorder %s491_s18, %s487_s8 }
 0x1db   : > { %p489_p5 = pnand %p488_p4, %p633_p3  ;;  %p494_p10 = por %p493_p8, %p492_p7 }
 0x1dd   : > { %p490_p6 = pneg %p489_p5 }
 0x1df   : > { %p495_p11 = pnand %p494_p10, %p490_p6 }
 0x1e1   : > { %498 = shalt.err (!%p495_p11)
}
 0x1e2   : > { %397 = dma.vmem_to_hbm [thread:$0]  (%p633_p3), %s289_s4, 128, %s291_s5, %s276_s6  }
 0x1e3 PF: > { %p403_p12 = scmp.ge.s32.totalorder %s565_s16, 2  ;;  %s302_s26 = sand.u32 1, %s537_s9  }
 0x1e4   : > { %s303_s28 = scalar_lea.sflag [#allocation4], %s302_s26 }
 0x1e5   : > { %p400_p13 = pnand %p403_p12, %p643_p9 }
 0x1e7   : > { %p401_p0 = pneg %p400_p13 }
 0x1e9   : > { %532 = dma.done.wait (%p401_p0), %s303_s28, 128  }
 0x1ea   : > { %534 = vsyncadd (%p401_p0), %s303_s28, 4294967168  ;;  %s15_s16 = sadd.s32 1, %s565_s16   ;;  %s722_s9 = smov %s541_s10 }
 0x1eb   : > { %p12_p1 = scmp.ge.s32.totalorder %s15_s16, 6   ;;  %s723_s10 = smov %s545_s11 }
 0x1ec   : > { %s724_s11 = smov %s651_s25  ;;  %s725_s12 = smov %s557_s14 }
 0x1ed   : > { %s726_s13 = smov %s561_s15  ;;  %s727_s14 = smov %s730_s19 }
 0x1ee   : > { %s728_s15 = smov %s734_s20  ;;  %14 = sbr.rel (!%p12_p1) target bundleno = 5 (0x5), region = 74 }
 0x1f3   :  { %309 = vsyncpa [#allocation4], 1 }
 0x1f4   :  { %311 = vsyncpa [#allocation4 + $0x1], 1 }

</bundles_post_ra>
